<compile_context>
chip_gen: v5e
topology: v5e:2x2
jax: 0.10.0
libtpu: 0.0.40
codegen_flags: <defaults>
</compile_context>

<pallas_src>
import functools

import jax
import jax.numpy as jnp
from jax.experimental import pallas as pl
from jax.experimental.pallas import tpu as pltpu


# ----------------------------------------------------------------------------
# Pass 1: per-sample Gram matrix G = sum_p x_p x_p^T and channel sums
#         s = sum_p x_p, accumulated over the spatial tiles of one sample.
# ----------------------------------------------------------------------------
def _stats_kernel(x_ref, g_ref, s_ref, *, t_hw, hw_valid, need_mask):
    j = pl.program_id(1)

    @pl.when(j == 0)
    def _():
        g_ref[...] = jnp.zeros_like(g_ref)
        s_ref[...] = jnp.zeros_like(s_ref)

    x = x_ref[...]  # (C, t_hw): channels on sublanes, spatial on 128 lanes

    if need_mask:  # only compiled in when H*W has no 128-aligned exact tiling
        col = jax.lax.broadcasted_iota(jnp.int32, x.shape, 1)
        x = jnp.where(j * t_hw + col < hw_valid, x, 0.0)

    # MXU contraction over the spatial axis: G += x @ x^T   -> (C, C)
    g_ref[...] += jax.lax.dot_general(
        x, x, (((1,), (1,)), ((), ())), preferred_element_type=jnp.float32)
    # XLU lane reduction: s += sum over spatial             -> (C, 1)
    s_ref[...] += jnp.sum(x, axis=1, keepdims=True)


# ----------------------------------------------------------------------------
# Pass 2: out = W_eff^T @ x + b_eff   (BN already folded into W_eff / b_eff)
# ----------------------------------------------------------------------------
def _proj_kernel(x_ref, wt_ref, b_ref, o_ref):
    o_ref[...] = (jnp.dot(wt_ref[...], x_ref[...],
                          preferred_element_type=jnp.float32)
                  + b_ref[...]).astype(o_ref.dtype)


# ----------------------------------------------------------------------------
# Helpers
# ----------------------------------------------------------------------------
def _pick_hw_tile(hw, target):
    """Largest lane-aligned tile <= target that divides hw (no padding)."""
    if hw <= target:
        return hw, False
    if hw % 128 == 0:
        best, t = 128, 128
        while t <= target:
            if hw % t == 0:
                best = t
            t += 128
        return best, False
    # Ragged fallback: 128-aligned tiles + in-kernel tail mask (pass 1);
    # pass-2 tail columns fall outside the logical output and are dropped
    # by the boundary writeback.  Never triggers for 128-divisible H*W.
    return target, True


def _vmem_limit(tile_bytes, floor=16 << 20, cap=100 << 20):
    return int(min(max(2 * tile_bytes + (2 << 20), floor), cap))


# ----------------------------------------------------------------------------
# Wrapper
# ----------------------------------------------------------------------------
def projection_head_forward(x_nchw, params, *, hw_tile_target=2048, eps=1e-5):
    """x_nchw: (N, C, H, W) float32 -> (N, proj_dim, H, W) float32."""
    N, C, H, W = x_nchw.shape
    HW = H * W
    M = N * HW
    w1, b1 = params["w1"], params["b1"]            # (C, C), (1, C)
    gamma, beta = params["gamma"], params["beta"]  # (1, C), (1, C)
    w2, b2 = params["w2"], params["b2"]            # (C, P), (1, P)
    P = w2.shape[1]

    x3 = x_nchw.reshape(N, C, HW)                  # free reshape, stays NCHW
    t_hw, need_mask = _pick_hw_tile(HW, hw_tile_target)
    n_tiles = -(-HW // t_hw)
    fdt = jnp.float32

    # ---------------- Pass 1: Gram + channel sums ----------------
    g_parts, s_parts = pl.pallas_call(
        functools.partial(_stats_kernel, t_hw=t_hw, hw_valid=HW,
                          need_mask=need_mask),
        grid=(N, n_tiles),
        in_specs=[pl.BlockSpec((None, C, t_hw), lambda n, j: (n, 0, j))],
        out_specs=(pl.BlockSpec((None, C, C), lambda n, j: (n, 0, 0)),
                   pl.BlockSpec((None, C, 1), lambda n, j: (n, 0, 0))),
        out_shape=(jax.ShapeDtypeStruct((N, C, C), fdt),
                   jax.ShapeDtypeStruct((N, C, 1), fdt)),
        compiler_params=pltpu.CompilerParams(
            dimension_semantics=("parallel", "arbitrary"),
            vmem_limit_bytes=_vmem_limit(4 * C * t_hw * 4)),
    )(x3)

    G = jnp.sum(g_parts, axis=0)                   # (C, C)
    s = jnp.sum(s_parts, axis=0).reshape(1, C)     # (1, C) per-channel sums

    # ---------------- Fold BN (batch stats) into conv2 (tiny, wrapper) ------
    sw = s @ w1                                    # colsum(x) @ W1      (1, C)
    sum_y = sw + M * b1                            # sum_p y1            (1, C)
    sum_ysq = (jnp.sum((G @ w1) * w1, axis=0, keepdims=True)
               + 2.0 * b1 * sw + M * b1 * b1)      # sum_p y1^2          (1, C)
    mean = sum_y / M
    # biased variance (torch training-mode BN); clamp guards f32 cancellation
    var = jnp.maximum(sum_ysq / M - mean * mean, 0.0)
    a = gamma * jax.lax.rsqrt(var + eps)
    shift = beta - mean * a
    w_eff = (w1 * a) @ w2                          # (C, P) = W1 diag(a) W2
    b_eff = (b1 * a + shift) @ w2 + b2             # (1, P)
    wt = jnp.asarray(w_eff.T, fdt)                 # (P, C) tiny transpose
    b_col = jnp.asarray(b_eff.reshape(P, 1), fdt)  # (P, 1)

    # ---------------- Pass 2: single matmul + bias, NCHW output -------------
    # TODO(synk): emit bf16 here if acceptable downstream (halves the dominant
    # HBM write); kept f32 to match the PyTorch module exactly.
    out3 = pl.pallas_call(
        _proj_kernel,
        grid=(N, n_tiles),
        in_specs=[pl.BlockSpec((None, C, t_hw), lambda n, j: (n, 0, j)),
                  pl.BlockSpec((P, C), lambda n, j: (0, 0)),
                  pl.BlockSpec((P, 1), lambda n, j: (0, 0))],
        out_specs=pl.BlockSpec((None, P, t_hw), lambda n, j: (n, 0, j)),
        out_shape=jax.ShapeDtypeStruct((N, P, HW), fdt),
        compiler_params=pltpu.CompilerParams(
            dimension_semantics=("parallel", "parallel"),
            vmem_limit_bytes=_vmem_limit(4 * (C + P) * t_hw * 4)),
    )(x3, wt, b_col)

    return out3.reshape(N, P, H, W)


# ----------------------------------------------------------------------------
# Plain-JAX reference (unfolded math) for correctness checks
# ----------------------------------------------------------------------------
def projection_head_reference(x_nchw, params, eps=1e-5):
    N, C, H, W = x_nchw.shape
    x = jnp.transpose(x_nchw, (0, 2, 3, 1)).reshape(-1, C)
    y1 = x @ params["w1"] + params["b1"]
    mean = jnp.mean(y1, axis=0, keepdims=True)
    var = jnp.mean(y1 * y1, axis=0, keepdims=True) - mean * mean
    y = (y1 - mean) * jax.lax.rsqrt(var + eps) * params["gamma"] + params["beta"]
    out = y @ params["w2"] + params["b2"]
    P = params["w2"].shape[1]
    return jnp.transpose(out.reshape(N, H, W, P), (0, 3, 1, 2))


if __name__ == "__main__":
    def make_params(key, C, P):
        k1, kb1, kg, kb, k2, kb2 = jax.random.split(key, 6)
        return {
            # Conv2d(dim_in, dim_in, 1): weight stored as (C_in, C_out)
            "w1": jax.random.normal(k1, (C, C), jnp.float32) * 0.1,
            "b1": jax.random.normal(kb1, (1, C), jnp.float32) * 0.1,
            # BatchNorm2d affine params
            "gamma": jax.random.normal(kg, (1, C), jnp.float32) * 0.1 + 1.0,
            "beta": jax.random.normal(kb, (1, C), jnp.float32) * 0.1,
            # Conv2d(dim_in, proj_dim, 1): stored as (C_in, P)
            "w2": jax.random.normal(k2, (C, P), jnp.float32) * 0.1,
            "b2": jax.random.normal(kb2, (1, P), jnp.float32) * 0.1,
        }

    key = jax.random.PRNGKey(0)
    kx, kp, kx2 = jax.random.split(key, 3)

    # Primary small case: dim_in=4, proj_dim=32, spatial 16x16 (single HW tile).
    N, C, H, W, P = 2, 4, 16, 16, 32
    x = jax.random.normal(kx, (N, C, H, W), dtype=jnp.float32)
    params = make_params(kp, C, P)

    out = jax.block_until_ready(projection_head_forward(x, params))
    ref = projection_head_reference(x, params)
    assert out.shape == (N, P, H, W)
    assert jnp.allclose(out, ref, atol=5e-4, rtol=5e-4), "mismatch vs reference"

    # Larger case exercising multiple spatial tiles per sample (HW=2304 -> 2x1152).
    N2, H2, W2 = 2, 48, 48
    x2 = jax.random.normal(kx2, (N2, C, H2, W2), dtype=jnp.float32)
    out2 = jax.block_until_ready(projection_head_forward(x2, params))
    ref2 = projection_head_reference(x2, params)
    assert jnp.allclose(out2, ref2, atol=5e-4, rtol=5e-4), "mismatch (tiled case)"

    print("KERNEL_OK")
</pallas_src>

<mosaic_0001>
module attributes {stable_mosaic.version = 11 : i64} {
  func.func @_stats_kernel(%arg0: i32, %arg1: i32, %arg2: memref<1x4x256xf32, #tpu.memory_space<vmem>>, %arg3: memref<1x4x4xf32, #tpu.memory_space<vmem>>, %arg4: memref<1x4x1xf32, #tpu.memory_space<vmem>>) attributes {dimension_semantics = [#tpu.dimension_semantics<parallel>, #tpu.dimension_semantics<arbitrary>], iteration_bounds = array<i64: 2, 1>, scalar_prefetch = 0 : i64, scratch_operands = 0 : i64, tpu.core_type = #tpu.core_type<tc>, window_params = [{transform_indices = @transform_0, window_bounds = array<i64: 1, 4, 256>}, {transform_indices = @transform_1, window_bounds = array<i64: 1, 4, 4>}, {transform_indices = @transform_2, window_bounds = array<i64: 1, 4, 1>}]} {
    %c0_i32 = arith.constant 0 : i32
    %0 = arith.cmpi eq, %arg1, %c0_i32 : i32
    %1 = arith.extui %0 : i1 to i32
    %c0_i32_0 = arith.constant 0 : i32
    %2 = arith.cmpi ne, %1, %c0_i32_0 : i32
    scf.if %2 {
      %cst_16 = arith.constant 0.000000e+00 : f32
      %20 = vector.broadcast %cst_16 : f32 to vector<4x4xf32>
      %c0_17 = arith.constant 0 : index
      %c0_18 = arith.constant 0 : index
      %c0_19 = arith.constant 0 : index
      %21 = vector.load %arg3[%c0_17, %c0_18, %c0_19] : memref<1x4x4xf32, #tpu.memory_space<vmem>>, vector<1x4x4xf32>
      %22 = vector.shape_cast %21 : vector<1x4x4xf32> to vector<4x4xf32>
      %23 = vector.shape_cast %20 : vector<4x4xf32> to vector<1x4x4xf32>
      tpu.vector_store %arg3[%c0_17, %c0_18, %c0_19], %23 {strides = array<i32>} : memref<1x4x4xf32, #tpu.memory_space<vmem>>, vector<1x4x4xf32>,
      %cst_20 = arith.constant 0.000000e+00 : f32
      %24 = vector.broadcast %cst_20 : f32 to vector<4x1xf32>
      %c0_21 = arith.constant 0 : index
      %c0_22 = arith.constant 0 : index
      %c0_23 = arith.constant 0 : index
      %25 = vector.load %arg4[%c0_21, %c0_22, %c0_23] : memref<1x4x1xf32, #tpu.memory_space<vmem>>, vector<1x4x1xf32>
      %26 = vector.shape_cast %25 : vector<1x4x1xf32> to vector<4x1xf32>
      %27 = vector.shape_cast %24 : vector<4x1xf32> to vector<1x4x1xf32>
      tpu.vector_store %arg4[%c0_21, %c0_22, %c0_23], %27 {strides = array<i32>} : memref<1x4x1xf32, #tpu.memory_space<vmem>>, vector<1x4x1xf32>,
    } else {
    }
    %c0 = arith.constant 0 : index
    %c0_1 = arith.constant 0 : index
    %c0_2 = arith.constant 0 : index
    %3 = vector.load %arg2[%c0, %c0_1, %c0_2] : memref<1x4x256xf32, #tpu.memory_space<vmem>>, vector<1x4x256xf32>
    %4 = vector.shape_cast %3 : vector<1x4x256xf32> to vector<4x256xf32>
    %c0_3 = arith.constant 0 : index
    %c0_4 = arith.constant 0 : index
    %c0_5 = arith.constant 0 : index
    %5 = vector.load %arg3[%c0_3, %c0_4, %c0_5] : memref<1x4x4xf32, #tpu.memory_space<vmem>>, vector<1x4x4xf32>
    %6 = vector.shape_cast %5 : vector<1x4x4xf32> to vector<4x4xf32>
    %cst = arith.constant dense<0.000000e+00> : vector<4x4xf32>
    %7 = tpu.matmul %4, %4, %cst {dimension_numbers = #tpu.dot_dimension_numbers<[1], [1], [0], [0], [0, 0, 1, 0], [], []>} : vector<4x256xf32>, vector<4x256xf32>, vector<4x4xf32> -> vector<4x4xf32>
    %8 = arith.addf %6, %7 : vector<4x4xf32>
    %c0_6 = arith.constant 0 : index
    %c0_7 = arith.constant 0 : index
    %c0_8 = arith.constant 0 : index
    %9 = vector.load %arg3[%c0_6, %c0_7, %c0_8] : memref<1x4x4xf32, #tpu.memory_space<vmem>>, vector<1x4x4xf32>
    %10 = vector.shape_cast %9 : vector<1x4x4xf32> to vector<4x4xf32>
    %11 = vector.shape_cast %8 : vector<4x4xf32> to vector<1x4x4xf32>
    tpu.vector_store %arg3[%c0_6, %c0_7, %c0_8], %11 {strides = array<i32>} : memref<1x4x4xf32, #tpu.memory_space<vmem>>, vector<1x4x4xf32>,
    %c0_9 = arith.constant 0 : index
    %c0_10 = arith.constant 0 : index
    %c0_11 = arith.constant 0 : index
    %12 = vector.load %arg4[%c0_9, %c0_10, %c0_11] : memref<1x4x1xf32, #tpu.memory_space<vmem>>, vector<1x4x1xf32>
    %13 = vector.shape_cast %12 : vector<1x4x1xf32> to vector<4x1xf32>
    %cst_12 = arith.constant dense<0.000000e+00> : vector<4xf32>
    %14 = vector.multi_reduction <add>, %4, %cst_12 [1] : vector<4x256xf32> to vector<4xf32>
    %15 = vector.shape_cast %14 : vector<4xf32> to vector<4x1xf32>
    %16 = arith.addf %13, %15 : vector<4x1xf32>
    %c0_13 = arith.constant 0 : index
    %c0_14 = arith.constant 0 : index
    %c0_15 = arith.constant 0 : index
    %17 = vector.load %arg4[%c0_13, %c0_14, %c0_15] : memref<1x4x1xf32, #tpu.memory_space<vmem>>, vector<1x4x1xf32>
    %18 = vector.shape_cast %17 : vector<1x4x1xf32> to vector<4x1xf32>
    %19 = vector.shape_cast %16 : vector<4x1xf32> to vector<1x4x1xf32>
    tpu.vector_store %arg4[%c0_13, %c0_14, %c0_15], %19 {strides = array<i32>} : memref<1x4x1xf32, #tpu.memory_space<vmem>>, vector<1x4x1xf32>,
    return
  }
  func.func @transform_0(%arg0: i32, %arg1: i32) -> (i32, i32, i32) {
    %c0_i32 = arith.constant 0 : i32
    %c0_i32_0 = arith.constant 0 : i32
    return %arg0, %c0_i32, %arg1 : i32, i32, i32
  }
  func.func @transform_1(%arg0: i32, %arg1: i32) -> (i32, i32, i32) {
    %c0_i32 = arith.constant 0 : i32
    %c0_i32_0 = arith.constant 0 : i32
    %c0_i32_1 = arith.constant 0 : i32
    return %arg0, %c0_i32, %c0_i32_0 : i32, i32, i32
  }
  func.func @transform_2(%arg0: i32, %arg1: i32) -> (i32, i32, i32) {
    %c0_i32 = arith.constant 0 : i32
    %c0_i32_0 = arith.constant 0 : i32
    %c0_i32_1 = arith.constant 0 : i32
    return %arg0, %c0_i32, %c0_i32_0 : i32, i32, i32
  }
}

</mosaic_0001>

<bundles_post_ra>
// kernel: tpu_custom_call.1
= control target key start
LH: loop header
LB: loop body
LE: loop exit
PB: predicated region body
PF: predicated region fallthrough
CT: control target
= control target key end

     0   :  { %8 = vsyncpa [#allocation3], 0  ;;  %s734_s0 = inlined_call_operand.hbm [shape: f32[2,4,256], index: 0, kind: input, shape index: {}]   ;;  %s735_s1 = inlined_call_operand.hbm [shape: f32[2,4,4], index: 1, kind: output, shape index: {0}]   ;;  %s736_s2 = inlined_call_operand.vmem [shape: f32[2,4,1], index: 2, kind: output, shape index: {1}]  }
   0x1   :  { %10 = vsyncpa [#allocation3 + $0x1], 0 }
   0x2   :  { %11 = vsyncpa [#allocation4], 0 }
   0x3   :  { %13 = vsyncpa [#allocation4 + $0x1], 0  ;;  %s606_s9 = smov 0   ;;  %s608_s10 = smov 0  }
   0x4   :  { %s610_s11 = smov 0   ;;  %s612_s12 = smov 0  }
   0x5   :  { %s614_s13 = smov 0   ;;  %s616_s14 = smov 0  }
   0x6 LB: > { %s397_s15 = sadd.s32 4294967295, %s588_s14   ;;  %s398_s16 = sadd.s32 4294967294, %s588_s14   ;;  %s588_s14 = sphi %s616_s14, %s19_s14   ;;  %s584_s13 = sphi %s614_s13, %s745_s13   ;;  %s580_s12 = sphi %s612_s12, %s744_s12   ;;  %s576_s11 = sphi %s610_s11, %s743_s11   ;;  %s572_s10 = sphi %s608_s10, %s742_s10   ;;  %s568_s9 = sphi %s606_s9, %s741_s9  }
   0x7   : > { %s31_s17 = sadd.s32 1, %s584_s13  ;;  %s40_s18 = sadd.s32 1, %s576_s11 }
   0x8   : > { %p33_p0 = scmp.ge.s32.totalorder %s31_s17, 2  ;;  %p47_p1 = scmp.ne.s32.totalorder %s576_s11, %s572_s10 }
   0x9   : > { %p48_p2 = scmp.eq.s32.totalorder %s588_s14, 0  ;;  %p53_p3 = scmp.ne.s32.totalorder %s572_s10, %s568_s9 }
   0xa   : > { %s747_s17 = smov (%p33_p0, %s31_s17), 0  ;;  %p54_p5 = scmp.eq.s32.totalorder %s397_s15, 0 }
   0xb   : > { %p647_p4 = por %p48_p2, %p47_p1  ;;  %s35_s20 = ssub.s32 %s584_s13, %s747_s17 }
   0xc   : > { %p77_p6 = scmp.eq.s32.totalorder %s397_s15, 1  ;;  %p38_p7 = scmp.eq.s32.totalorder %s35_s20, 0 }
   0xd   : > { %p653_p8 = por %p54_p5, %p53_p3  ;;  %p83_p10 = scmp.eq.s32.totalorder %s398_s16, 1 }
   0xe   : > { %p657_p9 = por %p77_p6, %p47_p1  ;;  %p400_p12 = scmp.ge.s32.totalorder %s588_s14, 2 }
   0xf   : > { %s662_s23 = scalar_select %p38_p7, %s576_s11, %s40_s18  }
  0x10   : > { %p664_p11 = por %p83_p10, %p53_p3  ;;  %p425_p13 = scmp.lt.s32.totalorder %s588_s14, 2 }
  0x11   : > { %s129_s25 = sand.u32 1, %s576_s11   ;;  %s412_s27 = sshll.u32 %s584_s13, 3 }
  0x12   : > { %s401_s26 = sshll.u32 %s129_s25, 3  ;;  %s140_s30 = scalar_lea.hbm %s734_s0, %s412_s27 }
  0x13   : > { %s133_s3 = scalar_lea.vmem [#allocation2], %s401_s26  ;;  %s142_s5 = sshll.u32 %s140_s30, 4  ;;  %s143_s5 = int_to_ptr.hbm [resolvable:$true] %s142_s5 }
  0x14   : > { %s144_s4 = sshll.u32 %s133_s3, 4  ;;  %p418_p0 = pnand %p425_p13, %p647_p4  ;;  %s145_s4 = int_to_ptr.vmem [resolvable:$true] %s144_s4 }
  0x15   : > { %p404_p1 = scmp.ge.s32.totalorder %s588_s14, 1  ;;  %p149_p2 = scmp.lt.s32.totalorder %s588_s14, 3 }
  0x16   : > { %s130_s6 = scalar_lea.sflag [#allocation3], %s129_s25 }
  0x17   : > { %420 = dma.hbm_to_vmem [thread:$0]  (!%p418_p0), %s143_s5, 128, %s145_s4, %s130_s6  }
  0x18   : > { %p150_p3 = pnand %p404_p1, %p149_p2 }
  0x19   : > { %s680_s7 = sand.u32 (!%p150_p3), 1, %s572_s10  }
  0x1a   : > { %153 = sbr.rel (%p150_p3) target bundleno = 185 (0xb9), region = 24  ;;  %s405_s8 = sshll.u32 (!%p150_p3), %s680_s7, 3 }
  0x1b   : > { %s156_s15 = scalar_lea.sflag (!%p150_p3), [#allocation3], %s680_s7  ;;  %s159_s16 = scalar_lea.vmem (!%p150_p3), [#allocation2], %s405_s8 }
  0x1f   : > { %559 = dma.done.wait (%p653_p8), %s156_s15, 128  }
  0x20   : > { %561 = vsyncadd (%p653_p8), %s156_s15, 4294967168  ;;  %v198_v0 = vld [vmem:[%s159_s16] sm:$0xff]  ;;  %vm260_vm0 = vcmask 1043456   ;;  %p186_p4 = scmp.lt.s32.totalorder %s580_s12, 1  ;;  %s406_s19 = sshll.u32 %s680_s7, 2  ;;  %vm194_vm1 = vcmask 27648  }
  0x21   : > { %201 = vst [vmem:[#allocation1] ss:$2 sm:$0xff] %v198_v0  ;;  %s178_s27 = scalar_lea.vmem [#allocation5], %s406_s19  ;;  %v590_v10 = vmov 0.0   ;;  %vm196_vm2 = vcmask 3072   ;;  %s409_s28 = sshll.u32 %s580_s12, 2 }
  0x22   : > { %s187_s18 = scalar_select %p186_p4, %s580_s12, 1  ;;  %195 = vst.msk [vmem:[%s178_s27] sm:$0xf] %vm194_vm1, %v590_v10 }
  0x23   : > { %s284_s3 = scalar_lea.hbm %s735_s1, %s409_s28  ;;  %s286_s4 = sshll.u32 %s178_s27, 4  ;;  %s287_s4 = int_to_ptr.vmem [resolvable:$true] %s286_s4 }
  0x24   : > { %s407_s20 = sshll.u32 %s187_s18, 2  ;;  %s288_s5 = sshll.u32 %s284_s3, 4  ;;  %s289_s5 = int_to_ptr.hbm [resolvable:$true] %s288_s5 }
  0x25   : > { %s189_s26 = scalar_lea.vmem %s736_s2, %s407_s20  ;;  %s270_s12 = scalar_lea.sflag [#allocation4], %s680_s7 }
  0x26   : > { %197 = vst.msk [vmem:[%s189_s26] sm:$0xf] %vm196_vm2, %v590_v10  ;;  %s520_s6 = sshra.s32 %s289_s5, 4  ;;  %s526_s18 = scalar_lea.hbm %s735_s1, 8  ;;  %s521_s6 = int_to_ptr.hbm [resolvable:$true] %s520_s6 }
  0x27   : > { %s522_s8 = scalar_lea.hbm %s521_s6, 4  ;;  %p527_p8 = scmp.lt.s32.totalorder %s521_s6, %s735_s1 }
  0x28   : > { %v202_v1 = vld.sshfl [vmem:[#allocation1] sm:$0xff pattern:$0x75316420]  ;;  %v203_v2 = vld.sshfl [vmem:[#allocation1 + $0x8] sm:$0xff pattern:$0x75316420]  ;;  %p523_p5 = scmp.ne.s32.totalorder %s521_s6, %s522_s8  ;;  %p528_p10 = scmp.lt.s32.totalorder %s526_s18, %s522_s8 }
  0x29   : > { %206 = vst [vmem:[#allocation1] ss:$2 sm:$0xff] %v198_v0  ;;  %v199_v15 = vld [vmem:[%s178_s27] sm:$0xf] }
  0x2a   : > { %p524_p6 = pnand %p523_p5, %p657_p9  ;;  %p529_p13 = por %p528_p10, %p527_p8 }
  0x2c   : > { %p525_p7 = pneg %p524_p6 }
  0x2d   : > { %v254_v11 = vld [vmem:[%s189_s26] sm:$0xf] }
  0x2e   : > { %p530_p0 = pnand %p529_p13, %p525_p7 }
  0x30   : > { %v207_v3 = vld.sshfl [vmem:[#allocation1] sm:$0xff pattern:$0x75316420]  ;;  %v208_v4 = vld.sshfl [vmem:[#allocation1 + $0x8] sm:$0xff pattern:$0x75316420] }
  0x31   : > { %226 = vmatpush.xpose.msra.mxu0 %v207_v3  ;;  %246 = vmatpush.xpose.msra.mxu1 %v208_v4  ;;  %255 = vst [vmem:[#allocation1] ss:$2 sm:$0xff] %v198_v0 }
  0x34   : > { %227 = vmatmul.f32.vlgmr.msra.gmra.mxu0 %v202_v1  ;;  %247 = vmatmul.f32.vlgmr.msra.gmra.mxu1 %v203_v2 }
  0x38   : > { %v256_v5 = vld.sshfl [vmem:[#allocation1] sm:$0xff pattern:$0x75316420]  ;;  %v257_v6 = vld.sshfl [vmem:[#allocation1 + $0x8] sm:$0xff pattern:$0x75316420] }
  0x39   : > { %v261_v7 = vsel %vm260_vm0, %v256_v5, 0.0  ;;  %v262_v8 = vsel %vm260_vm0, %v257_v6, 0.0 }
  0x3a   : > { %v263_v9 = vadd.f32 %v262_v8, %v261_v7 }
  0x3c   : > { %264 = vadd.xlane.f32.xlu0 %v263_v9 }
  0xaf   : > { %v265_v12 = vpop.xlane.xlu0 %264 }
  0xb0   : > { %v266_v13 = vadd.f32 %v265_v12, %v254_v11 }
  0xb1   : > { %v228_v14 = vpop.f32.mrf.mxu0  ;;  %v248_v16 = vpop.f32.mrf.mxu1 }
  0xb2   : > { %v249_v17 = vadd.f32 %v248_v16, %v228_v14  ;;  %268 = vst.msk [vmem:[%s189_s26] sm:$0xf] %vm196_vm2, %v266_v13 }
  0xb4   : > { %v251_v18 = vadd.f32 %v249_v17, %v199_v15 }
  0xb6   : > { %253 = vst.msk [vmem:[%s178_s27] sm:$0xf] %vm194_vm1, %v251_v18 }
  0xb7   : > { %533 = shalt.err (!%p530_p0)
}
  0xb8   : > { %415 = dma.vmem_to_hbm [thread:$0]  (%p657_p9), %s287_s4, 64, %s289_s5, %s270_s12  }
  0xb9 PF: > { %s303_s7 = sand.u32 1, %s568_s9   ;;  %p422_p1 = pnand %p400_p12, %p664_p11 }
  0xba   : > { %s304_s21 = scalar_lea.sflag [#allocation4], %s303_s7 }
  0xbb   : > { %p423_p2 = pneg %p422_p1 }
  0xbd   : > { %563 = dma.done.wait (%p423_p2), %s304_s21, 64  }
  0xbe   : > { %565 = vsyncadd (%p423_p2), %s304_s21, 4294967232  ;;  %s19_s14 = sadd.s32 1, %s588_s14   ;;  %s741_s9 = smov %s572_s10 }
  0xbf   : > { %p16_p3 = scmp.ge.s32.totalorder %s19_s14, 4   ;;  %s742_s10 = smov %s576_s11 }
  0xc0   : > { %s743_s11 = smov %s662_s23  ;;  %s744_s12 = smov %s584_s13 }
  0xc1   : > { %s745_s13 = smov %s747_s17  ;;  %18 = sbr.rel (!%p16_p3) target bundleno = 6 (0x6), region = 85 }
  0xc6   :  { %317 = vsyncpa [#allocation3], 1 }
  0xc7   :  { %319 = vsyncpa [#allocation3 + $0x1], 1 }
  0xc8   :  { %320 = vsyncpa [#allocation4], 1 }
  0xc9   :  { %322 = vsyncpa [#allocation4 + $0x1], 1 }

</bundles_post_ra>
